<compile_context>
chip_gen: v5e
topology: v5e:2x2
jax: 0.10.0
libtpu: 0.0.40
codegen_flags: <defaults>
</compile_context>

<pallas_src>
import functools

import jax
import jax.numpy as jnp
from jax import lax
from jax.experimental import pallas as pl
from jax.experimental.pallas import tpu as pltpu


_LANE = 128
_BLOCK_CAP_BYTES = 4 * 1024 * 1024   # per x-block cap; in+out double-buffered ~4x this
_TARGET_BYTES = 2 * 1024 * 1024      # aim for at least this much x data per grid step
_VMEM_LIMIT_BYTES = 32 * 1024 * 1024  # explicit scoped-VMEM limit (safe v5e/v6e/v7x)
_NB_MAX = 8                          # cap on images packed (unrolled) per grid step


def _round_up(x, m):
    return (x + m - 1) // m * m


def prepare_ca_params(w1, b1, w2, b2, w3, b3, w4, b4):
    """Center-tap extraction / branch stacking.  Do once at parameter load."""
    ws = jnp.concatenate([w1[:, :, 1, 1], w2[:, :, 1, 1], w3[:, :, 1, 1]],
                         axis=0)                      # (3*Cr, C)
    bs = jnp.concatenate([b1, b2, b3], axis=0)        # (3*Cr,)
    w4c = w4[:, :, 1, 1]                              # (C, 3*Cr)
    return ws, bs, w4c, b4


def _fused_kernel(x_ref, ws_ref, bs_ref, w4_ref, b4_ref, o_ref, *, nb, inv_hw):
    """Pool -> SE -> scale for NB images resident in one VMEM block."""
    for i in range(nb):  # static unroll (nb <= _NB_MAX)
        xi = x_ref[i]                                            # (C, HWp)
        # global average pool (pad lanes are zero, so sum/HW is exact)
        avg = jnp.sum(xi, axis=-1, keepdims=True) * inv_hw       # (C, 1)
        # c1/c2/c3 + concat: stacked center-tap matvec + bias + ReLU
        h = jnp.dot(ws_ref[...], avg, preferred_element_type=jnp.float32)
        h = jnp.maximum(h + bs_ref[...], 0.0)                    # (3*Cr, 1)
        # c4: center-tap matvec + bias + Sigmoid
        y = jnp.dot(w4_ref[...], h, preferred_element_type=jnp.float32)
        y = jax.nn.sigmoid(y + b4_ref[...])                      # (C, 1)
        o_ref[i] = (xi * y).astype(o_ref.dtype)


def _scale_kernel(x_ref, y_ref, o_ref):
    """Pure elementwise per-channel scale (split path)."""
    o_ref[...] = (x_ref[...] * y_ref[...]).astype(o_ref.dtype)


def ca_layer(x, ws, bs, w4c, b4, *, block_cap_bytes=_BLOCK_CAP_BYTES):
    """x: (N, C, H, W); ws/bs/w4c/b4 from prepare_ca_params."""
    N, C, H, W = x.shape
    HW = H * W
    Cr3 = ws.shape[0]
    itemsize = jnp.dtype(x.dtype).itemsize

    x_flat = x.reshape(N, C, HW)
    per_image_bytes = C * _round_up(HW, _LANE) * itemsize

    # Choose how many images to pack per grid step (fused path), or None -> split.
    nb = None
    if per_image_bytes <= block_cap_bytes:
        for cand in range(1, min(N, _NB_MAX) + 1):
            if N % cand:
                continue
            if cand * per_image_bytes > block_cap_bytes:
                break
            nb = cand
            if cand * per_image_bytes >= _TARGET_BYTES:
                break

    if nb is not None:
        # ---------------- fused single-read path ----------------
        HWp = _round_up(HW, _LANE)
        if HWp != HW:
            x_flat = jnp.pad(x_flat, ((0, 0), (0, 0), (0, HWp - HW)))
        kern = functools.partial(_fused_kernel, nb=nb, inv_hw=1.0 / HW)
        out = pl.pallas_call(
            kern,
            out_shape=jax.ShapeDtypeStruct((N, C, HWp), x.dtype),
            grid_spec=pltpu.PrefetchScalarGridSpec(
                num_scalar_prefetch=0,
                grid=(N // nb,),
                in_specs=[
                    pl.BlockSpec((nb, C, HWp), lambda i: (i, 0, 0)),
                    pl.BlockSpec((Cr3, C), lambda i: (0, 0)),
                    pl.BlockSpec((Cr3, 1), lambda i: (0, 0)),
                    pl.BlockSpec((C, Cr3), lambda i: (0, 0)),
                    pl.BlockSpec((C, 1), lambda i: (0, 0)),
                ],
                out_specs=pl.BlockSpec((nb, C, HWp), lambda i: (i, 0, 0)),
            ),
            compiler_params=pltpu.CompilerParams(
                dimension_semantics=("parallel",),
                vmem_limit_bytes=_VMEM_LIMIT_BYTES),
        )(x_flat, ws, bs[:, None], w4c, b4[:, None])
        if HWp != HW:
            out = out[:, :, :HW]
        return out.reshape(N, C, H, W)

    # ---------------- split path (image too large for one VMEM block) ----------------
    # O(N*C) attention math in a tiny JAX preamble, batched across N (one matmul).
    means = jnp.mean(x_flat.astype(jnp.float32), axis=-1)             # (N, C)
    h = jnp.maximum(means @ ws.T + bs[None, :], 0.0)                  # (N, 3*Cr)
    yv = jax.nn.sigmoid(h @ w4c.T + b4[None, :]).astype(x.dtype)      # (N, C)
    y3 = yv[:, :, None]                                               # (N, C, 1)

    T = max(_LANE, (block_cap_bytes // (C * itemsize)) // _LANE * _LANE)
    HWp = _round_up(HW, T)
    if HWp != HW:
        x_flat = jnp.pad(x_flat, ((0, 0), (0, 0), (0, HWp - HW)))
    out = pl.pallas_call(
        _scale_kernel,
        out_shape=jax.ShapeDtypeStruct((N, C, HWp), x.dtype),
        grid_spec=pltpu.PrefetchScalarGridSpec(
            num_scalar_prefetch=0,
            grid=(N, HWp // T),
            in_specs=[
                pl.BlockSpec((None, C, T), lambda n, t: (n, 0, t)),
                pl.BlockSpec((None, C, 1), lambda n, t: (n, 0, 0)),
            ],
            out_specs=pl.BlockSpec((None, C, T), lambda n, t: (n, 0, t)),
        ),
        compiler_params=pltpu.CompilerParams(
            dimension_semantics=("parallel", "parallel"),
            vmem_limit_bytes=_VMEM_LIMIT_BYTES),
    )(x_flat, y3)
    if HWp != HW:
        out = out[:, :, :HW]
    return out.reshape(N, C, H, W)


def ref_ca_layer(x, w1, b1, w2, b2, w3, b3, w4, b4):
    """Pure-JAX reference with the *full* dilated convolutions (for checking)."""
    def conv(inp, w, b, pad, dil):
        out = lax.conv_general_dilated(
            inp, w, window_strides=(1, 1),
            padding=[(pad, pad), (pad, pad)],
            rhs_dilation=(dil, dil),
            dimension_numbers=("NCHW", "OIHW", "NCHW"))
        return out + b[None, :, None, None]

    y = jnp.mean(x, axis=(2, 3), keepdims=True)       # AdaptiveAvgPool2d(1)
    c1 = jax.nn.relu(conv(y, w1, b1, 3, 3))
    c2 = jax.nn.relu(conv(y, w2, b2, 5, 5))
    c3 = jax.nn.relu(conv(y, w3, b3, 7, 7))
    cat = jnp.concatenate([c1, c2, c3], axis=1)
    y4 = jax.nn.sigmoid(conv(cat, w4, b4, 1, 1))
    return x * y4


if __name__ == "__main__":
    # Module-consistent small shapes: channel must be >= reduction (16).
    N, C, H, W = 2, 32, 16, 16
    reduction = 16
    Cr = C // reduction                                # 2

    key = jax.random.PRNGKey(0)
    ks = jax.random.split(key, 9)
    x = jax.random.normal(ks[0], (N, C, H, W), dtype=jnp.float32)

    # Deterministic synthetic parameters (Conv2d default: bias=True).
    w1 = jax.random.normal(ks[1], (Cr, C, 3, 3), jnp.float32) * 0.1
    b1 = jax.random.normal(ks[2], (Cr,), jnp.float32) * 0.1
    w2 = jax.random.normal(ks[3], (Cr, C, 3, 3), jnp.float32) * 0.1
    b2 = jax.random.normal(ks[4], (Cr,), jnp.float32) * 0.1
    w3 = jax.random.normal(ks[5], (Cr, C, 3, 3), jnp.float32) * 0.1
    b3 = jax.random.normal(ks[6], (Cr,), jnp.float32) * 0.1
    w4 = jax.random.normal(ks[7], (C, 3 * Cr, 3, 3), jnp.float32) * 0.1
    b4 = jax.random.normal(ks[8], (C,), jnp.float32) * 0.1

    # Hoist the center-tap extraction/stacking out of the per-call path.
    ws, bs, w4c, b4c = prepare_ca_params(w1, b1, w2, b2, w3, b3, w4, b4)

    ref = jax.block_until_ready(
        ref_ca_layer(x, w1, b1, w2, b2, w3, b3, w4, b4))

    # Fused single-read path (used for shapes that fit one VMEM block).
    out = jax.block_until_ready(ca_layer(x, ws, bs, w4c, b4c))
    if not jnp.allclose(out, ref, atol=1e-5, rtol=1e-5):
        raise AssertionError("Pallas CALayer (fused path) mismatch vs reference")

    # Also exercise the split (HW-tiled) path by forcing a tiny block cap.
    out_split = jax.block_until_ready(
        ca_layer(x, ws, bs, w4c, b4c, block_cap_bytes=16 * 1024))
    if not jnp.allclose(out_split, ref, atol=1e-5, rtol=1e-5):
        raise AssertionError("Pallas CALayer (split path) mismatch vs reference")

    print("KERNEL_OK")
</pallas_src>

<mosaic_0001>
module attributes {stable_mosaic.version = 11 : i64} {
  func.func @_fused_kernel(%arg0: i32, %arg1: memref<2x32x256xf32, #tpu.memory_space<vmem>>, %arg2: memref<6x32xf32, #tpu.memory_space<vmem>>, %arg3: memref<6x1xf32, #tpu.memory_space<vmem>>, %arg4: memref<32x6xf32, #tpu.memory_space<vmem>>, %arg5: memref<32x1xf32, #tpu.memory_space<vmem>>, %arg6: memref<2x32x256xf32, #tpu.memory_space<vmem>>) attributes {dimension_semantics = [#tpu.dimension_semantics<parallel>], iteration_bounds = array<i64: 1>, scalar_prefetch = 0 : i64, scratch_operands = 0 : i64, tpu.core_type = #tpu.core_type<tc>, window_params = [{transform_indices = @transform_0, window_bounds = array<i64: 2, 32, 256>}, {pipeline_mode = #tpu.pipeline_mode<synchronous>, transform_indices = @transform_1, window_bounds = array<i64: 6, 32>}, {pipeline_mode = #tpu.pipeline_mode<synchronous>, transform_indices = @transform_2, window_bounds = array<i64: 6, 1>}, {pipeline_mode = #tpu.pipeline_mode<synchronous>, transform_indices = @transform_3, window_bounds = array<i64: 32, 6>}, {pipeline_mode = #tpu.pipeline_mode<synchronous>, transform_indices = @transform_4, window_bounds = array<i64: 32, 1>}, {transform_indices = @transform_5, window_bounds = array<i64: 2, 32, 256>}]} {
    %c0 = arith.constant 0 : index
    %c0_0 = arith.constant 0 : index
    %c0_1 = arith.constant 0 : index
    %0 = vector.load %arg1[%c0, %c0_0, %c0_1] : memref<2x32x256xf32, #tpu.memory_space<vmem>>, vector<1x32x256xf32>
    %1 = vector.shape_cast %0 : vector<1x32x256xf32> to vector<32x256xf32>
    %cst = arith.constant dense<0.000000e+00> : vector<32xf32>
    %2 = vector.multi_reduction <add>, %1, %cst [1] : vector<32x256xf32> to vector<32xf32>
    %3 = vector.shape_cast %2 : vector<32xf32> to vector<32x1xf32>
    %cst_2 = arith.constant 3.906250e-03 : f32
    %4 = vector.broadcast %cst_2 : f32 to vector<32x1xf32>
    %5 = arith.mulf %3, %4 : vector<32x1xf32>
    %c0_3 = arith.constant 0 : index
    %c0_4 = arith.constant 0 : index
    %6 = vector.load %arg2[%c0_3, %c0_4] : memref<6x32xf32, #tpu.memory_space<vmem>>, vector<6x32xf32>
    %cst_5 = arith.constant dense<0.000000e+00> : vector<6x1xf32>
    %7 = tpu.matmul %6, %5, %cst_5 {dimension_numbers = #tpu.dot_dimension_numbers<[1], [0], [0], [1], [0, 0, 1, 1], [], []>} : vector<6x32xf32>, vector<32x1xf32>, vector<6x1xf32> -> vector<6x1xf32>
    %c0_6 = arith.constant 0 : index
    %c0_7 = arith.constant 0 : index
    %8 = vector.load %arg3[%c0_6, %c0_7] : memref<6x1xf32, #tpu.memory_space<vmem>>, vector<6x1xf32>
    %9 = arith.addf %7, %8 : vector<6x1xf32>
    %cst_8 = arith.constant 0.000000e+00 : f32
    %10 = vector.broadcast %cst_8 : f32 to vector<6x1xf32>
    %11 = arith.maximumf %9, %10 : vector<6x1xf32>
    %c0_9 = arith.constant 0 : index
    %c0_10 = arith.constant 0 : index
    %12 = vector.load %arg4[%c0_9, %c0_10] : memref<32x6xf32, #tpu.memory_space<vmem>>, vector<32x6xf32>
    %cst_11 = arith.constant dense<0.000000e+00> : vector<32x1xf32>
    %13 = tpu.matmul %12, %11, %cst_11 {dimension_numbers = #tpu.dot_dimension_numbers<[1], [0], [0], [1], [0, 0, 1, 1], [], []>} : vector<32x6xf32>, vector<6x1xf32>, vector<32x1xf32> -> vector<32x1xf32>
    %c0_12 = arith.constant 0 : index
    %c0_13 = arith.constant 0 : index
    %14 = vector.load %arg5[%c0_12, %c0_13] : memref<32x1xf32, #tpu.memory_space<vmem>>, vector<32x1xf32>
    %15 = arith.addf %13, %14 : vector<32x1xf32>
    %16 = arith.negf %15 : vector<32x1xf32>
    %17 = math.exp %16 : vector<32x1xf32>
    %cst_14 = arith.constant 1.000000e+00 : f32
    %18 = vector.broadcast %cst_14 : f32 to vector<32x1xf32>
    %19 = arith.addf %18, %17 : vector<32x1xf32>
    %20 = arith.divf %18, %19 : vector<32x1xf32>
    %21 = vector.broadcast %20 : vector<32x1xf32> to vector<32x256xf32>
    %22 = arith.mulf %1, %21 : vector<32x256xf32>
    %c0_15 = arith.constant 0 : index
    %c0_16 = arith.constant 0 : index
    %c0_17 = arith.constant 0 : index
    %23 = vector.load %arg6[%c0_15, %c0_16, %c0_17] : memref<2x32x256xf32, #tpu.memory_space<vmem>>, vector<1x32x256xf32>
    %24 = vector.shape_cast %23 : vector<1x32x256xf32> to vector<32x256xf32>
    %25 = vector.shape_cast %22 : vector<32x256xf32> to vector<1x32x256xf32>
    tpu.vector_store %arg6[%c0_15, %c0_16, %c0_17], %25 {strides = array<i32>} : memref<2x32x256xf32, #tpu.memory_space<vmem>>, vector<1x32x256xf32>,
    %c1 = arith.constant 1 : index
    %c0_18 = arith.constant 0 : index
    %c0_19 = arith.constant 0 : index
    %26 = vector.load %arg1[%c1, %c0_18, %c0_19] : memref<2x32x256xf32, #tpu.memory_space<vmem>>, vector<1x32x256xf32>
    %27 = vector.shape_cast %26 : vector<1x32x256xf32> to vector<32x256xf32>
    %cst_20 = arith.constant dense<0.000000e+00> : vector<32xf32>
    %28 = vector.multi_reduction <add>, %27, %cst_20 [1] : vector<32x256xf32> to vector<32xf32>
    %29 = vector.shape_cast %28 : vector<32xf32> to vector<32x1xf32>
    %cst_21 = arith.constant 3.906250e-03 : f32
    %30 = vector.broadcast %cst_21 : f32 to vector<32x1xf32>
    %31 = arith.mulf %29, %30 : vector<32x1xf32>
    %c0_22 = arith.constant 0 : index
    %c0_23 = arith.constant 0 : index
    %32 = vector.load %arg2[%c0_22, %c0_23] : memref<6x32xf32, #tpu.memory_space<vmem>>, vector<6x32xf32>
    %cst_24 = arith.constant dense<0.000000e+00> : vector<6x1xf32>
    %33 = tpu.matmul %32, %31, %cst_24 {dimension_numbers = #tpu.dot_dimension_numbers<[1], [0], [0], [1], [0, 0, 1, 1], [], []>} : vector<6x32xf32>, vector<32x1xf32>, vector<6x1xf32> -> vector<6x1xf32>
    %c0_25 = arith.constant 0 : index
    %c0_26 = arith.constant 0 : index
    %34 = vector.load %arg3[%c0_25, %c0_26] : memref<6x1xf32, #tpu.memory_space<vmem>>, vector<6x1xf32>
    %35 = arith.addf %33, %34 : vector<6x1xf32>
    %cst_27 = arith.constant 0.000000e+00 : f32
    %36 = vector.broadcast %cst_27 : f32 to vector<6x1xf32>
    %37 = arith.maximumf %35, %36 : vector<6x1xf32>
    %c0_28 = arith.constant 0 : index
    %c0_29 = arith.constant 0 : index
    %38 = vector.load %arg4[%c0_28, %c0_29] : memref<32x6xf32, #tpu.memory_space<vmem>>, vector<32x6xf32>
    %cst_30 = arith.constant dense<0.000000e+00> : vector<32x1xf32>
    %39 = tpu.matmul %38, %37, %cst_30 {dimension_numbers = #tpu.dot_dimension_numbers<[1], [0], [0], [1], [0, 0, 1, 1], [], []>} : vector<32x6xf32>, vector<6x1xf32>, vector<32x1xf32> -> vector<32x1xf32>
    %c0_31 = arith.constant 0 : index
    %c0_32 = arith.constant 0 : index
    %40 = vector.load %arg5[%c0_31, %c0_32] : memref<32x1xf32, #tpu.memory_space<vmem>>, vector<32x1xf32>
    %41 = arith.addf %39, %40 : vector<32x1xf32>
    %42 = arith.negf %41 : vector<32x1xf32>
    %43 = math.exp %42 : vector<32x1xf32>
    %cst_33 = arith.constant 1.000000e+00 : f32
    %44 = vector.broadcast %cst_33 : f32 to vector<32x1xf32>
    %45 = arith.addf %44, %43 : vector<32x1xf32>
    %46 = arith.divf %44, %45 : vector<32x1xf32>
    %47 = vector.broadcast %46 : vector<32x1xf32> to vector<32x256xf32>
    %48 = arith.mulf %27, %47 : vector<32x256xf32>
    %c1_34 = arith.constant 1 : index
    %c0_35 = arith.constant 0 : index
    %c0_36 = arith.constant 0 : index
    %49 = vector.load %arg6[%c1_34, %c0_35, %c0_36] : memref<2x32x256xf32, #tpu.memory_space<vmem>>, vector<1x32x256xf32>
    %50 = vector.shape_cast %49 : vector<1x32x256xf32> to vector<32x256xf32>
    %51 = vector.shape_cast %48 : vector<32x256xf32> to vector<1x32x256xf32>
    tpu.vector_store %arg6[%c1_34, %c0_35, %c0_36], %51 {strides = array<i32>} : memref<2x32x256xf32, #tpu.memory_space<vmem>>, vector<1x32x256xf32>,
    return
  }
  func.func @transform_0(%arg0: i32) -> (i32, i32, i32) {
    %c0_i32 = arith.constant 0 : i32
    %c0_i32_0 = arith.constant 0 : i32
    %c0_i32_1 = arith.constant 0 : i32
    return %arg0, %c0_i32, %c0_i32_0 : i32, i32, i32
  }
  func.func @transform_1(%arg0: i32) -> (i32, i32) {
    %c0_i32 = arith.constant 0 : i32
    %c0_i32_0 = arith.constant 0 : i32
    %c0_i32_1 = arith.constant 0 : i32
    return %c0_i32, %c0_i32_0 : i32, i32
  }
  func.func @transform_2(%arg0: i32) -> (i32, i32) {
    %c0_i32 = arith.constant 0 : i32
    %c0_i32_0 = arith.constant 0 : i32
    %c0_i32_1 = arith.constant 0 : i32
    return %c0_i32, %c0_i32_0 : i32, i32
  }
  func.func @transform_3(%arg0: i32) -> (i32, i32) {
    %c0_i32 = arith.constant 0 : i32
    %c0_i32_0 = arith.constant 0 : i32
    %c0_i32_1 = arith.constant 0 : i32
    return %c0_i32, %c0_i32_0 : i32, i32
  }
  func.func @transform_4(%arg0: i32) -> (i32, i32) {
    %c0_i32 = arith.constant 0 : i32
    %c0_i32_0 = arith.constant 0 : i32
    %c0_i32_1 = arith.constant 0 : i32
    return %c0_i32, %c0_i32_0 : i32, i32
  }
  func.func @transform_5(%arg0: i32) -> (i32, i32, i32) {
    %c0_i32 = arith.constant 0 : i32
    %c0_i32_0 = arith.constant 0 : i32
    %c0_i32_1 = arith.constant 0 : i32
    return %arg0, %c0_i32, %c0_i32_0 : i32, i32, i32
  }
}

</mosaic_0001>

<bundles_post_ra>
// kernel: tpu_custom_call.1
= control target key start
LH: loop header
LB: loop body
LE: loop exit
PB: predicated region body
PF: predicated region fallthrough
CT: control target
= control target key end

     0   :  { %10 = vsyncpa [#allocation3], 0  ;;  %s830_s0 = inlined_call_operand.hbm [shape: f32[2,32,256], index: 0, kind: input, shape index: {}]   ;;  %s831_s1 = inlined_call_operand.vmem [shape: f32[6,32], index: 1, kind: input, shape index: {}]   ;;  %s832_s2 = inlined_call_operand.vmem [shape: f32[6,1], index: 2, kind: input, shape index: {}]   ;;  %s833_s3 = inlined_call_operand.vmem [shape: f32[32,6], index: 3, kind: input, shape index: {}]   ;;  %s834_s4 = inlined_call_operand.vmem [shape: f32[32,1], index: 4, kind: input, shape index: {}]   ;;  %s835_s5 = inlined_call_operand.hbm [shape: f32[2,32,256], index: 5, kind: output, shape index: {}]  }
   0x1   :  { %11 = vsyncpa [#allocation4], 0  ;;  %s16_s20 = sshll.u32 %s830_s0, 4  ;;  %s603_s21 = smov [#allocation2]   ;;  %s17_s20 = int_to_ptr.hbm [resolvable:$true] %s16_s20 }
   0x2   :  { %s18_s22 = sshll.u32 %s603_s21, 4  ;;  %s604_s23 = smov 256   ;;  %s19_s22 = int_to_ptr.vmem [resolvable:$true] %s18_s22 }
   0x3   :  { %s605_s24 = smov 16  }
   0x4   :  { %24 = dma.hbm_to_vmem [thread:$0]  %s17_s20, 2048, %s19_s22, [#allocation3], %s604_s23, %s604_s23, %s605_s24  }
   0x5   :  { %599 = dma.done.wait [#allocation3], 2048  }
   0x6   :  { %600 = vsyncadd [#allocation3], 4294965248  ;;  %v644_v0 = vld [vmem:[#allocation2 + $0x70] sm:$0xff]  ;;  %v646_v1 = vld [vmem:[#allocation2 + $0x78] sm:$0xff]  ;;  %vm63_vm0 = vcmask 261120   ;;  %vm109_vm1 = vcmask 1045504  }
   0x7   :  { %v648_v2 = vld [vmem:[#allocation2 + $0x50] sm:$0xff]  ;;  %v272_v3 = vadd.f32 %v646_v1, %v644_v0  ;;  %v652_v4 = vld [vmem:[#allocation2 + $0x58] sm:$0xff]  ;;  %v662_v9 = vld [vmem:[#allocation2 + $0x60] sm:$0xff]  ;;  %vm96_vm2 = vcmask 48128   ;;  %v606_v60 = vmov 0   ;;  %s476_s0 = sshll.u32 %s835_s5, 4  ;;  %s477_s0 = int_to_ptr.hbm [resolvable:$true] %s476_s0 }
   0x8   :  { %v654_v5 = vld [vmem:[#allocation2 + $0x30] sm:$0xff]  ;;  %v656_v6 = vld [vmem:[#allocation2 + $0x38] sm:$0xff]  ;;  %v266_v7 = vadd.f32 %v652_v4, %v648_v2  ;;  %v664_v10 = vld [vmem:[#allocation2 + $0x68] sm:$0xff]  ;;  %517 = vset.pattern.permute.xlu0 %v606_v60  ;;  %516 = vset.pattern.permute.xlu2 %v606_v60 }
   0x9   :  { %v54_v8 = vadd.f32 %v656_v6, %v654_v5  ;;  %273 = vadd.xlane.f32.xlu0 %v272_v3  ;;  %v666_v11 = vld [vmem:[#allocation2 + $0x40] sm:$0xff]  ;;  %v668_v12 = vld [vmem:[#allocation2 + $0x48] sm:$0xff]  ;;  %v269_v15 = vadd.f32 %v664_v10, %v662_v9  ;;  %v680_v18 = vld [vmem:[#allocation2 + $0x10] sm:$0xff]  ;;  %518 = vset.pattern.permute.xlu1 %v606_v60 }
   0xa   :  { %267 = vadd.xlane.f32.xlu1 %v266_v7  ;;  %v670_v13 = vld [vmem:[#allocation2 + $0x20] sm:$0xff]  ;;  %v672_v14 = vld [vmem:[#allocation2 + $0x28] sm:$0xff]  ;;  %v263_v16 = vadd.f32 %v668_v12, %v666_v11  ;;  %v682_v19 = vld [vmem:[#allocation2 + $0x18] sm:$0xff] }
   0xb   :  { %55 = vadd.xlane.f32.xlu2 %v54_v8  ;;  %v51_v17 = vadd.f32 %v672_v14, %v670_v13  ;;  %v684_v20 = vld [vmem:[#allocation2] sm:$0xff]  ;;  %v686_v21 = vld [vmem:[#allocation2 + $0x8] sm:$0xff]  ;;  %v48_v22 = vadd.f32 %v682_v19, %v680_v18  ;;  %v90_v52 = vld [vmem:[%s833_s3 + $0x10] sm:$0xff] }
   0xc   :  { %v45_v23 = vadd.f32 %v686_v21, %v684_v20  ;;  %v279_v36 = vld [vmem:[%s831_s1] sm:$0x3f]  ;;  %v89_v51 = vld [vmem:[%s833_s3 + $0x8] sm:$0xff]  ;;  %v91_v53 = vld [vmem:[%s833_s3 + $0x18] sm:$0xff] }
   0xd   :  { %v61_v41 = vld [vmem:[%s831_s1] sm:$0x3f]  ;;  %v93_v55 = vld [vmem:[%s834_s4 + $0x8] sm:$0xff]  ;;  %v94_v3 = vld [vmem:[%s834_s4 + $0x10] sm:$0xff] }
   0xe   :  { %v62_v42 = vld [vmem:[%s832_s2] sm:$0x3f] }
   0xf   :  { %v280_v43 = vld [vmem:[%s832_s2] sm:$0x3f] }
  0x10   :  { %v88_v50 = vld [vmem:[%s833_s3] sm:$0xff] }
  0x11   :  { %270 = vadd.xlane.f32.xlu0 %v269_v15  ;;  %v92_v54 = vld [vmem:[%s834_s4] sm:$0xff] }
  0x12   :  { %264 = vadd.xlane.f32.xlu1 %v263_v16 }
  0x13   :  { %52 = vadd.xlane.f32.xlu2 %v51_v17 }
  0x19   :  { %49 = vadd.xlane.f32.xlu0 %v48_v22 }
  0x1a   :  { %46 = vadd.xlane.f32.xlu1 %v45_v23 }
  0x7c   :  { %v274_v24 = vpop.xlane.xlu0 %273 }
  0x7d   :  { %v268_v25 = vpop.xlane.xlu1 %267  ;;  %v278_v26 = vmul.f32 0.00390625, %v274_v24 }
  0x7e   :  { %v56_v27 = vpop.xlane.xlu2 %55  ;;  %v276_v34 = vmul.f32 0.00390625, %v268_v25 }
  0x7f   :  { %v60_v28 = vmul.f32 0.00390625, %v56_v27  ;;  %296 = vmatpush.msra.mxu2 %v278_v26 }
  0x81   :  { %79 = vmatpush.msra.mxu0 %v60_v28 }
  0x84   :  { %v271_v29 = vpop.xlane.xlu0 %270 }
  0x85   :  { %v277_v30 = vmul.f32 0.00390625, %v271_v29  ;;  %v265_v31 = vpop.xlane.xlu1 %264 }
  0x86   :  { %v53_v32 = vpop.xlane.xlu2 %52  ;;  %v275_v35 = vmul.f32 0.00390625, %v265_v31 }
  0x87   :  { %v59_v33 = vmul.f32 0.00390625, %v53_v32  ;;  %297 = vmatpush.msra.mxu2 %v277_v30  ;;  %v95_v30 = vld [vmem:[%s834_s4 + $0x18] sm:$0xff]  ;;  %s607_s4 = smov [#allocation5]  }
  0x88   :  { %s474_s20 = sshll.u32 %s607_s4, 4  ;;  %s475_s20 = int_to_ptr.vmem [resolvable:$true] %s474_s20 }
  0x89   :  { %80 = vmatpush.msra.mxu0 %v59_v33  ;;  %298 = vmatpush.msra.mxu2 %v276_v34 }
  0x8b   :  { %299 = vmatpush.msra.mxu2 %v275_v35 }
  0x8c   :  { %499 = vmatmul.msk.f32.vlgmr.msra.gmra.mxu2 %vm63_vm0, %v279_v36  ;;  %v50_v37 = vpop.xlane.xlu0 %49 }
  0x8d   :  { %v58_v38 = vmul.f32 0.00390625, %v50_v37  ;;  %v47_v39 = vpop.xlane.xlu1 %46 }
  0x8e   :  { %v57_v40 = vmul.f32 0.00390625, %v47_v39 }
  0x8f   :  { %81 = vmatpush.msra.mxu0 %v58_v38 }
  0x91   :  { %82 = vmatpush.msra.mxu0 %v57_v40 }
  0x92   :  { %489 = vmatmul.msk.f32.vlgmr.msra.gmra.mxu0 %vm63_vm0, %v61_v41 }
 0x10f   :  { %v84_v44 = vpop.f32.mrf.mxu0  ;;  %v301_v45 = vpop.f32.mrf.mxu2 }
 0x110   :  { %v85_v46 = vadd.f32 %v84_v44, %v62_v42  ;;  %v302_v47 = vadd.f32 %v301_v45, %v280_v43 }
 0x112   :  { %v87_v48 = vmax.f32 %v85_v46, 0.0  ;;  %v304_v49 = vmax.f32 %v302_v47, 0.0 }
 0x114   :  { %490 = vmatpush.msk.msrb.mxu0 %vm109_vm1, %v87_v48  ;;  %509 = vmatpush.msk.msra.mxu1 %vm109_vm1, %v87_v48 }
 0x115   :  { %510 = vmatpush.msk.msra.mxu3 %vm109_vm1, %v304_v49  ;;  %491 = vmatmul.msk.f32.vlgmr.msrb.gmra.mxu0 %vm96_vm2, %v88_v50 }
 0x116   :  { %492 = vmatmul.msk.f32.vlgmr.msra.gmra.mxu1 %vm96_vm2, %v89_v51  ;;  %502 = vmatmul.msk.f32.vlgmr.msra.gmra.mxu3 %vm96_vm2, %v89_v51 }
 0x117   :  { %500 = vmatpush.msk.msrb.mxu2 %vm109_vm1, %v304_v49 }
 0x118   :  { %501 = vmatmul.msk.f32.vlgmr.msrb.gmra.mxu2 %vm96_vm2, %v88_v50 }
 0x11e   :  { %493 = vmatmul.msk.f32.gmra.mxu1 %vm96_vm2, %v90_v52  ;;  %503 = vmatmul.msk.f32.gmra.mxu3 %vm96_vm2, %v90_v52 }
 0x126   :  { %494 = vmatmul.msk.f32.gmra.mxu1 %vm96_vm2, %v91_v53  ;;  %504 = vmatmul.msk.f32.gmra.mxu3 %vm96_vm2, %v91_v53 }
 0x192   :  { %v130_v56 = vpop.f32.mrf.mxu0 }
 0x193   :  { %v131_v57 = vadd.f32 %v130_v56, %v92_v54  ;;  %v133_v58 = vpop.f32.mrf.mxu1 }
 0x194   :  { %v134_v59 = vadd.f32 %v133_v58, %v93_v55 }
 0x195   :  { %v495_v61 = vmul.f32 -1.442695, %v131_v57 }
 0x196   :  { %v496_v62 = vmul.f32 -1.442695, %v134_v59 }
 0x197   :  { %519 = vpow2.f32 %v495_v61 }
 0x198   :  { %521 = vpow2.f32 %v496_v62 }
 0x199   :  { %v348_v63 = vpop.f32.mrf.mxu3 }
 0x19a   :  { %v349_v7 = vadd.f32 %v348_v63, %v93_v55 }
 0x19b   :  { %v136_v8 = vpop.f32.mrf.mxu1  ;;  %v345_v15 = vpop.f32.mrf.mxu2 }
 0x19c   :  { %v506_v16 = vmul.f32 -1.442695, %v349_v7  ;;  %v137_v17 = vadd.f32 %v136_v8, %v94_v3  ;;  %v346_v22 = vadd.f32 %v345_v15, %v92_v54 }
 0x19d   :  { %v520_v23 = vpop.eup %519 }
 0x19e   :  { %v522_v24 = vpop.eup %521  ;;  %v154_v25 = vadd.f32 1.0, %v520_v23  ;;  %523 = vpow2.f32 %v506_v16  ;;  %v497_v26 = vmul.f32 -1.442695, %v137_v17  ;;  %v505_v28 = vmul.f32 -1.442695, %v346_v22 }
 0x19f   :  { %v155_v27 = vadd.f32 1.0, %v522_v24 }
 0x1a0   :  { %525 = vrcp.f32 %v154_v25  ;;  %v169_v41 = vand.u32 2147483648, %v154_v25  ;;  %vm163_vm3 = vweird.f32 %v154_v25  ;;  %v167_v48 = vand.u32 2147483647, %v154_v25 }
 0x1a1   :  { %527 = vrcp.f32 %v155_v27  ;;  %v351_v29 = vpop.f32.mrf.mxu3  ;;  %v182_v52 = vand.u32 2147483647, %v155_v27  ;;  %v184_v53 = vand.u32 2147483648, %v155_v27  ;;  %vm178_vm8 = vweird.f32 %v155_v27 }
 0x1a2   :  { %529 = vpow2.f32 %v497_v26  ;;  %v352_v31 = vadd.f32 %v351_v29, %v94_v3  ;;  %v170_v55 = vor.u32 1.1754944e-38, %v169_v41  ;;  %vm168_vm7 = vcmp.eq.f32.partialorder %v167_v48, 8.507059e+37 }
 0x1a3   :  { %531 = vpow2.f32 %v505_v28  ;;  %v139_v32 = vpop.f32.mrf.mxu1  ;;  %vm183_vm10 = vcmp.eq.f32.partialorder %v182_v52, 8.507059e+37  ;;  %v185_v8 = vor.u32 1.1754944e-38, %v184_v53 }
 0x1a4   :  { %v524_v33 = vpop.eup %523  ;;  %v507_v34 = vmul.f32 -1.442695, %v352_v31  ;;  %v140_v35 = vadd.f32 %v139_v32, %v95_v30 }
 0x1a5   :  { %v728_v36 = vadd.f32 1.0, %v524_v33 }
 0x1a6   :  { %v526_v37 = vpop.eup %525  ;;  %533 = vpow2.f32 %v507_v34  ;;  %v498_v38 = vmul.f32 -1.442695, %v140_v35 }
 0x1a7   :  { %v528_v39 = vpop.eup %527  ;;  %535 = vrcp.f32 %v728_v36  ;;  %v159_v40 = vmul.f32 %v526_v37, %v154_v25  ;;  %vm164_vm4 = vweird.f32 %v526_v37 }
 0x1a8   :  { %v530_v42 = vpop.eup %529  ;;  %537 = vpow2.f32 %v498_v38  ;;  %v174_v43 = vmul.f32 %v528_v39, %v155_v27  ;;  %vm179_vm5 = vweird.f32 %v528_v39  ;;  %vm739_vm6 = vmor %vm163_vm3, %vm164_vm4 }
 0x1a9   :  { %v532_v44 = vpop.eup %531  ;;  %v731_v45 = vadd.f32 1.0, %v530_v42  ;;  %v354_v46 = vpop.f32.mrf.mxu3  ;;  %v160_v47 = vsub.f32 1.0, %v159_v40  ;;  %vm180_vm9 = vmor %vm178_vm8, %vm179_vm5 }
 0x1aa   :  { %v733_v49 = vadd.f32 1.0, %v532_v44  ;;  %v355_v50 = vadd.f32 %v354_v46, %v95_v30  ;;  %v175_v51 = vsub.f32 1.0, %v174_v43 }
 0x1ab   :  { %539 = vrcp.f32 %v731_v45  ;;  %v161_v54 = vmul.f32 %v526_v37, %v160_v47  ;;  %v197_v27 = vand.u32 2147483647, %v731_v45  ;;  %v199_v28 = vand.u32 2147483648, %v731_v45 }
 0x1ac   :  { %v534_v56 = vpop.eup %533  ;;  %541 = vrcp.f32 %v733_v49  ;;  %v508_v57 = vmul.f32 -1.442695, %v355_v50  ;;  %v176_v58 = vmul.f32 %v528_v39, %v175_v51  ;;  %vm378_vm11 = vweird.f32 %v733_v49 }
 0x1ad   :  { %v743_v60 = vpop.eup %535  ;;  %v745_v61 = vadd.f32 1.0, %v534_v56  ;;  %v162_v62 = vadd.f32 %v526_v37, %v161_v54  ;;  %v384_v32 = vand.u32 2147483648, %v733_v49  ;;  %vm193_vm13 = vweird.f32 %v731_v45 }
 0x1ae   :  { %v538_v63 = vpop.eup %537  ;;  %543 = vpow2.f32 %v508_v57  ;;  %v177_v3 = vadd.f32 %v528_v39, %v176_v58  ;;  %v389_v22 = vmul.f32 %v743_v60, %v728_v36  ;;  %vm768_vm15 = vcmp.eq.f32.partialorder %v197_v27, 8.507059e+37 }
 0x1af   :  { %v747_v7 = vadd.f32 1.0, %v538_v63  ;;  %v166_v15 = vsel %vm739_vm6, %v526_v37, %v162_v62  ;;  %545 = vrcp.f32 %v745_v61  ;;  %v382_v37 = vand.u32 2147483647, %v733_v49 }
 0x1b0   :  { %v181_v16 = vsel %vm180_vm9, %v528_v39, %v177_v3  ;;  %v171_v17 = vsel %vm168_vm7, %v170_v55, %v166_v15  ;;  %v390_v33 = vsub.f32 1.0, %v389_v22  ;;  %v200_v42 = vor.u32 1.1754944e-38, %v199_v28 }
 0x1b1   :  { %v540_v23 = vpop.eup %539  ;;  %547 = vrcp.f32 %v747_v7  ;;  %v186_v24 = vsel %vm183_vm10, %v185_v8, %v181_v16  ;;  %220 = vperm.xlu2 %516, %v171_v17   ;;  %v385_v47 = vor.u32 1.1754944e-38, %v384_v32  ;;  %vm383_vm2 = vcmp.eq.f32.partialorder %v382_v37, 8.507059e+37 }
 0x1b2   :  { %v542_v25 = vpop.eup %541  ;;  %225 = vperm.xlu0 %517, %v186_v24   ;;  %v189_v26 = vmul.f32 %v540_v23, %v731_v45  ;;  %vm194_vm14 = vweird.f32 %v540_v23  ;;  %v391_v45 = vmul.f32 %v743_v60, %v390_v33  ;;  %vm208_vm3 = vweird.f32 %v747_v7 }
 0x1b3   :  { %v374_v29 = vmul.f32 %v542_v25, %v733_v49  ;;  %vm379_vm12 = vweird.f32 %v542_v25  ;;  %vm195_vm1 = vmor %vm193_vm13, %vm194_vm14  ;;  %v214_v49 = vand.u32 2147483648, %v747_v7  ;;  %v212_v56 = vand.u32 2147483647, %v747_v7 }
 0x1b4   :  { %v544_v30 = vpop.eup %543  ;;  %v190_v31 = vsub.f32 1.0, %v189_v26  ;;  %vm774_vm0 = vmor %vm378_vm11, %vm379_vm12  ;;  %v392_v58 = vadd.f32 %v743_v60, %v391_v45  ;;  %vm394_vm5 = vweird.f32 %v743_v60  ;;  %vm393_vm6 = vweird.f32 %v728_v36 }
 0x1b5   :  { %v761_v34 = vadd.f32 1.0, %v544_v30  ;;  %v375_v35 = vsub.f32 1.0, %v374_v29  ;;  %v764_v38 = vpop.eup %545  ;;  %v399_v63 = vand.u32 2147483648, %v728_v36  ;;  %v397_v8 = vand.u32 2147483647, %v728_v36  ;;  %vm395_vm8 = vmor %vm393_vm6, %vm394_vm5 }
 0x1b6   :  { %v191_v39 = vmul.f32 %v540_v23, %v190_v31  ;;  %v404_v51 = vmul.f32 %v764_v38, %v745_v61  ;;  %v215_v16 = vor.u32 1.1754944e-38, %v214_v49  ;;  %vm213_vm9 = vcmp.eq.f32.partialorder %v212_v56, 8.507059e+37 }
 0x1b7   :  { %v548_v40 = vpop.eup %547  ;;  %549 = vrcp.f32 %v761_v34  ;;  %v376_v43 = vmul.f32 %v542_v25, %v375_v35  ;;  %v396_v22 = vsel %vm395_vm8, %v743_v60, %v392_v58  ;;  %vm398_vm10 = vcmp.eq.f32.partialorder %v397_v8, 8.507059e+37 }
 0x1b8   :  { %v192_v44 = vadd.f32 %v540_v23, %v191_v39  ;;  %v204_v48 = vmul.f32 %v548_v40, %v747_v7  ;;  %vm209_vm4 = vweird.f32 %v548_v40  ;;  %v405_v3 = vsub.f32 1.0, %v404_v51 }
 0x1b9   :  { %v377_v50 = vadd.f32 %v542_v25, %v376_v43  ;;  %vm210_vm7 = vmor %vm208_vm3, %vm209_vm4  ;;  %v429_v36 = vand.u32 2147483648, %v761_v34  ;;  %vm409_vm12 = vweird.f32 %v764_v38  ;;  %vm423_vm13 = vweird.f32 %v761_v34 }
 0x1ba   :  { %v196_v52 = vsel %vm195_vm1, %v540_v23, %v192_v44  ;;  %v205_v53 = vsub.f32 1.0, %v204_v48  ;;  %v406_v26 = vmul.f32 %v764_v38, %v405_v3  ;;  %v427_v60 = vand.u32 2147483647, %v761_v34 }
 0x1bb   :  { %v201_v54 = vsel %vm768_vm15, %v200_v42, %v196_v52  ;;  %v381_v55 = vsel %vm774_vm0, %v542_v25, %v377_v50  ;;  %v400_v25 = vor.u32 1.1754944e-38, %v399_v63  ;;  %v414_v31 = vand.u32 2147483648, %v745_v61 }
 0x1bc   :  { %230 = vperm.xlu1 %518, %v201_v54   ;;  %v386_v57 = vsel %vm383_vm2, %v385_v47, %v381_v55  ;;  %v206_v59 = vmul.f32 %v548_v40, %v205_v53  ;;  %v407_v30 = vadd.f32 %v764_v38, %v406_v26  ;;  %vm408_vm15 = vweird.f32 %v745_v61 }
 0x1bd   :  { %v550_v62 = vpop.eup %549  ;;  %435 = vperm.xlu2 %516, %v386_v57   ;;  %v401_v28 = vsel %vm398_vm10, %v400_v25, %v396_v22  ;;  %v412_v32 = vand.u32 2147483647, %v745_v61  ;;  %vm410_vm0 = vmor %vm408_vm15, %vm409_vm12  ;;  %v430_v35 = vor.u32 1.1754944e-38, %v429_v36  ;;  %vm428_vm1 = vcmp.eq.f32.partialorder %v427_v60, 8.507059e+37 }
 0x1be   :  { %v207_v15 = vadd.f32 %v548_v40, %v206_v59  ;;  %v419_v17 = vmul.f32 %v550_v62, %v761_v34  ;;  %vm424_vm11 = vweird.f32 %v550_v62  ;;  %v411_v37 = vsel %vm410_vm0, %v764_v38, %v407_v30 }
 0x1bf   :  { %vm425_vm14 = vmor %vm423_vm13, %vm424_vm11  ;;  %v415_v39 = vor.u32 1.1754944e-38, %v414_v31  ;;  %vm413_vm2 = vcmp.eq.f32.partialorder %v412_v32, 8.507059e+37 }
 0x1c0   :  { %v211_v23 = vsel %vm210_vm7, %v548_v40, %v207_v15  ;;  %v420_v24 = vsub.f32 1.0, %v419_v17 }
 0x1c1   :  { %v216_v27 = vsel %vm213_vm9, %v215_v16, %v211_v23  ;;  %v416_v41 = vsel %vm413_vm2, %v415_v39, %v411_v37 }
 0x1c2   :  { %v421_v7 = vmul.f32 %v550_v62, %v420_v24 }
 0x1c4   :  { %440 = vperm.xlu1 %518, %v401_v28   ;;  %v422_v29 = vadd.f32 %v550_v62, %v421_v7 }
 0x1c5   :  { %235 = vperm.xlu2 %516, %v216_v27  }
 0x1c6   :  { %v426_v33 = vsel %vm425_vm14, %v550_v62, %v422_v29 }
 0x1c7   :  { %v431_v40 = vsel %vm428_vm1, %v430_v35, %v426_v33 }
 0x1cc   :  { %450 = vperm.xlu1 %518, %v431_v40  }
 0x1cd   :  { %445 = vperm.xlu2 %516, %v416_v41  }
 0x20b   :  { %v221_v34 = vpop.permute.xlu2 %220 }
 0x20c   :  { %v238_v42 = vmul.f32 %v221_v34, %v684_v20  ;;  %v239_v43 = vmul.f32 %v221_v34, %v686_v21 }
 0x20e   :  { %246 = vst [vmem:[#allocation5] sm:$0xff] %v238_v42 }
 0x20f   :  { %247 = vst [vmem:[#allocation5 + $0x8] sm:$0xff] %v239_v43 }
 0x217   :  { %v436_v61 = vpop.permute.xlu2 %435 }
 0x218   :  { %v453_v44 = vmul.f32 %v436_v61, %v666_v11  ;;  %v454_v46 = vmul.f32 %v436_v61, %v668_v12 }
 0x21a   :  { %462 = vst [vmem:[#allocation5 + $0x40] sm:$0xff] %v453_v44 }
 0x21b   :  { %463 = vst [vmem:[#allocation5 + $0x48] sm:$0xff] %v454_v46 }
 0x21f   :  { %v236_v38 = vpop.permute.xlu2 %235 }
 0x220   :  { %v244_v47 = vmul.f32 %v236_v38, %v654_v5  ;;  %v245_v45 = vmul.f32 %v236_v38, %v656_v6 }
 0x222   :  { %252 = vst [vmem:[#allocation5 + $0x30] sm:$0xff] %v244_v47 }
 0x223   :  { %253 = vst [vmem:[#allocation5 + $0x38] sm:$0xff] %v245_v45 }
 0x224   :  { %v226_v48 = vpop.permute.xlu0 %225 }
 0x225   :  { %v240_v20 = vmul.f32 %v226_v48, %v680_v18  ;;  %v241_v21 = vmul.f32 %v226_v48, %v682_v19 }
 0x227   :  { %248 = vst [vmem:[#allocation5 + $0x10] sm:$0xff] %v240_v20  ;;  %v446_v50 = vpop.permute.xlu2 %445 }
 0x228   :  { %249 = vst [vmem:[#allocation5 + $0x18] sm:$0xff] %v241_v21  ;;  %v457_v11 = vmul.f32 %v446_v50, %v662_v9  ;;  %v458_v12 = vmul.f32 %v446_v50, %v664_v10 }
 0x22a   :  { %466 = vst [vmem:[#allocation5 + $0x60] sm:$0xff] %v457_v11 }
 0x22b   :  { %467 = vst [vmem:[#allocation5 + $0x68] sm:$0xff] %v458_v12 }
 0x22e   :  { %v231_v51 = vpop.permute.xlu1 %230 }
 0x22f   :  { %v242_v5 = vmul.f32 %v231_v51, %v670_v13  ;;  %v243_v6 = vmul.f32 %v231_v51, %v672_v14 }
 0x231   :  { %250 = vst [vmem:[#allocation5 + $0x20] sm:$0xff] %v242_v5 }
 0x232   :  { %251 = vst [vmem:[#allocation5 + $0x28] sm:$0xff] %v243_v6 }
 0x236   :  { %v441_v52 = vpop.permute.xlu1 %440 }
 0x237   :  { %v455_v18 = vmul.f32 %v441_v52, %v648_v2  ;;  %v456_v19 = vmul.f32 %v441_v52, %v652_v4 }
 0x239   :  { %464 = vst [vmem:[#allocation5 + $0x50] sm:$0xff] %v455_v18 }
 0x23a   :  { %465 = vst [vmem:[#allocation5 + $0x58] sm:$0xff] %v456_v19 }
 0x23e   :  { %v451_v9 = vpop.permute.xlu1 %450 }
 0x23f   :  { %v459_v10 = vmul.f32 %v451_v9, %v644_v0  ;;  %v460_v13 = vmul.f32 %v451_v9, %v646_v1 }
 0x241   :  { %468 = vst [vmem:[#allocation5 + $0x70] sm:$0xff] %v459_v10 }
 0x242   :  { %469 = vst [vmem:[#allocation5 + $0x78] sm:$0xff] %v460_v13 }
 0x243   :  { %482 = dma.vmem_to_hbm [thread:$0]  %s475_s20, 2048, %s477_s0, [#allocation4], %s604_s23, %s604_s23, %s605_s24  }
 0x244   :  { %601 = dma.done.wait [#allocation4], 2048  }
 0x245   :  { %602 = vsyncadd [#allocation4], 4294965248 }
 0x246   :  { %487 = vsyncpa [#allocation3], 1 }
 0x247   :  { %488 = vsyncpa [#allocation4], 1 }

</bundles_post_ra>
